<compile_context>
chip_gen: v7x
topology: tpu7x:2x2x1
jax: 0.10.0
libtpu: 0.0.40
codegen_flags: <defaults>
</compile_context>

<pallas_src>
import functools
import math

import jax
import jax.numpy as jnp
from jax import lax
from jax.experimental import pallas as pl
from jax.experimental.pallas import tpu as pltpu


_INV_SQRT2 = 0.7071067811865476
_SQRT_2_OVER_PI = 0.7978845608028654


def _adapter_kernel(x_ref, w1_ref, w2_ref, o_ref, *, approx_gelu):
    # (tm, idim) row tile in its native dtype; MXU accumulates in f32.
    h = jnp.dot(x_ref[...], w1_ref[...], preferred_element_type=jnp.float32)

    if approx_gelu:
        # tanh approximation: runs on the EUP slot (opt-in, v5e f32 configs).
        h = 0.5 * h * (1.0 + jnp.tanh(_SQRT_2_OVER_PI * (h + 0.044715 * h * h * h)))
    else:
        # Exact erf GELU (matches torch F.gelu default).
        h = 0.5 * h * (1.0 + lax.erf(h * _INV_SQRT2))

    # Second matmul in the (uniform) weight dtype, f32 accumulation.
    y = jnp.dot(h.astype(w2_ref.dtype), w2_ref[...],
                preferred_element_type=jnp.float32)

    # ReLU + store.
    o_ref[...] = jnp.maximum(y, 0.0).astype(o_ref.dtype)


def _round_up(a, b):
    return ((a + b - 1) // b) * b


def _tpu_hw_params():
    """(vmem_capacity_bytes, tensorcores_per_chip) with safe fallbacks."""
    vmem_cap = 128 * 1024 * 1024
    n_cores = 1
    try:
        info = pltpu.get_tpu_info()
        vmem_cap = int(info.vmem_capacity_bytes)
    except Exception:
        pass
    try:
        kind = jax.devices()[0].device_kind.lower()
        if ("v7" in kind) or ("tpu7" in kind):
            n_cores = 2
            vmem_cap = min(vmem_cap, 64 * 1024 * 1024)
    except Exception:
        pass
    return vmem_cap, n_cores


def _per_row_bytes(idim, bneck, itemsize):
    # x + out double-buffered, f32 h + y intermediates, compute-dtype copy of h
    # that feeds the second matmul.
    return 2 * 2 * idim * itemsize + 4 * (idim + bneck) + bneck * itemsize


def _choose_tm(m, idim, bneck, itemsize, w_bytes, tm_req, budget, n_cores):
    """Large, sublane-aligned, VMEM-budgeted row tile; >=4 steps; even on v7x."""
    sub = 16 if itemsize <= 2 else 8            # min sublane tile for dtype
    tm = max(sub, min(int(tm_req), _round_up(m, sub)))
    tm = _round_up(tm, sub)

    # Target >= 4 grid steps when there is enough work so the double-buffered
    # pipeline actually hides the x-tile read / output writeback.
    if m >= 4 * sub:
        tm = min(tm, _round_up(pl.cdiv(m, 4), sub))

    # VMEM budget with the single-buffered resident weights subtracted.
    per_row = _per_row_bytes(idim, bneck, itemsize)
    avail = max(budget - w_bytes, per_row * sub)
    max_rows = max(sub, (avail // per_row // sub) * sub)
    tm = int(min(tm, max_rows))

    # MXU M-dim alignment: whole multiples of 256 (v6e/v7x MXU rows are 256;
    # 256 is also a multiple of v5e's 128), else 128.
    if tm >= 256:
        tm = (tm // 256) * 256
    elif tm >= 128:
        tm = (tm // 128) * 128

    # Even grid when two TensorCores share the "parallel" axis (v7x).
    if n_cores >= 2 and m > tm:
        steps = pl.cdiv(m, tm)
        if steps % 2:
            steps += 1
            tm = max(sub, _round_up(pl.cdiv(m, steps), sub))
    return tm


def adapter_relu(x, lin1, lin2, *, tm=512, approx_gelu=False):
    """x: (..., idim) -> (..., idim)  == relu(gelu(x @ lin1) @ lin2)."""
    idim, bneck = lin1.shape
    assert lin2.shape == (bneck, idim)
    orig_shape = x.shape
    x2 = x.reshape(-1, idim)
    m = x2.shape[0]

    # Dtype hygiene: uniform MXU operand dtype (bf16 stays full-rate, and the
    # resident weight bytes are halved for bf16 activations).
    compute_dtype = x2.dtype
    w1 = lin1.astype(compute_dtype)
    w2 = lin2.astype(compute_dtype)

    # Lane-dense bottleneck: zero-pad to the next multiple of 128.  Padded lin1
    # columns are zero (-> gelu(0) = 0) and the matching lin2 rows are zero, so
    # the result is mathematically identical.
    bneck_p = _round_up(bneck, 128)
    if bneck_p != bneck:
        w1 = jnp.pad(w1, ((0, 0), (0, bneck_p - bneck)))
        w2 = jnp.pad(w2, ((0, bneck_p - bneck), (0, 0)))

    itemsize = jnp.dtype(compute_dtype).itemsize
    w_bytes = 2 * idim * bneck_p * itemsize

    vmem_cap, n_cores = _tpu_hw_params()
    # Scoped-VMEM ceiling from the actual generation: generous on 128 MiB parts,
    # conservative (~38 MiB) on v7x's 64 MiB per TensorCore.
    vmem_limit_cap = int(min(0.6 * vmem_cap, 96 * 1024 * 1024))
    vmem_budget = vmem_limit_cap - (2 * 1024 * 1024)

    # Guard: whole-array-resident weights must leave room for at least one
    # minimal double-buffered row tile under physical VMEM.
    sub = 16 if itemsize <= 2 else 8
    min_tile_bytes = sub * _per_row_bytes(idim, bneck_p, itemsize)
    if w_bytes + min_tile_bytes > int(0.9 * vmem_cap):
        # TODO(synk): K-tile the weights (extra grid axis + f32 accumulator
        # scratch) for adapters too large for whole-array VMEM residency.
        raise ValueError(
            f"adapter weights ({w_bytes / 2**20:.1f} MiB) too large for "
            f"whole-array VMEM residency ({vmem_cap / 2**20:.0f} MiB VMEM)")

    tm = _choose_tm(m, idim, bneck_p, itemsize, w_bytes, tm, vmem_budget, n_cores)
    grid = (pl.cdiv(m, tm),)

    # Advisory cost hint so XLA can overlap neighbors with this call.
    cost = pl.CostEstimate(
        flops=4 * m * idim * bneck_p,
        transcendentals=m * bneck_p,
        bytes_accessed=2 * m * idim * itemsize + w_bytes,  # w_bytes covers both weights
    )

    # Per-step VMEM estimate (+15% for Mosaic internal scratch / layout copies);
    # only raise the scoped limit when the estimate actually needs it.
    est = tm * _per_row_bytes(idim, bneck_p, itemsize) + w_bytes
    est = int(est * 1.15)
    compiler_kwargs = dict(dimension_semantics=("parallel",))
    if est > 12 * 1024 * 1024:
        compiler_kwargs["vmem_limit_bytes"] = int(
            min(vmem_limit_cap, _round_up(est + (1 << 20), 1 << 20)))

    kernel = functools.partial(_adapter_kernel, approx_gelu=approx_gelu)

    out = pl.pallas_call(
        kernel,
        out_shape=jax.ShapeDtypeStruct((m, idim), x.dtype),
        grid_spec=pltpu.PrefetchScalarGridSpec(
            num_scalar_prefetch=0,
            grid=grid,
            in_specs=[
                # x row tile: pipelined (double-buffered) through VMEM.
                pl.BlockSpec((tm, idim), lambda i: (i, 0)),
                # weights: whole-array VMEM residency, no double buffering.
                pl.BlockSpec(memory_space=pltpu.MemorySpace.VMEM),
                pl.BlockSpec(memory_space=pltpu.MemorySpace.VMEM),
            ],
            out_specs=pl.BlockSpec((tm, idim), lambda i: (i, 0)),
        ),
        compiler_params=pltpu.CompilerParams(**compiler_kwargs),
        cost_estimate=cost,
    )(x2, w1, w2)

    return out.reshape(orig_shape)


def init_adapter_params(key, idim, bottleneck_dim=None, dtype=jnp.float32):
    """Deterministic init mirroring AdapterReLU.__init__/reset_parameters."""
    bottleneck_dim = bottleneck_dim if bottleneck_dim else idim // 4
    # kaiming_uniform_(a=sqrt(5)) on a (idim, bottleneck) tensor:
    #   fan_in = bottleneck, gain = sqrt(2/(1+5)) -> bound = 1/sqrt(fan_in)
    bound = 1.0 / math.sqrt(bottleneck_dim)
    lin1 = jax.random.uniform(
        key, (idim, bottleneck_dim), dtype=dtype, minval=-bound, maxval=bound
    )
    lin2 = jnp.zeros((bottleneck_dim, idim), dtype=dtype)
    return lin1, lin2


def _reference(x, l1, l2):
    # High-precision reference matching torch: relu(gelu(x @ l1) @ l2).
    h = jnp.dot(x, l1, precision=lax.Precision.HIGHEST)
    h = jax.nn.gelu(h, approximate=False)
    y = jnp.dot(h, l2, precision=lax.Precision.HIGHEST)
    return jax.nn.relu(y)


if __name__ == "__main__":
    key = jax.random.PRNGKey(0)
    k_x, k_w, k_w2, k_x2, k_xb = jax.random.split(key, 5)

    # Small shapes consistent with the module.
    batch, seq, idim = 2, 8, 32
    x = jax.random.normal(k_x, (batch, seq, idim), dtype=jnp.float32)

    # Faithful module init (lin2 == 0 -> module output is all zeros post-ReLU).
    lin1, lin2 = init_adapter_params(k_w, idim)
    out = adapter_relu(x, lin1, lin2)
    jax.block_until_ready(out)
    assert out.shape == x.shape
    ref = _reference(x, lin1, lin2)
    assert jnp.allclose(out, ref, atol=1e-4, rtol=1e-4), "mismatch (zero lin2)"

    # Nonzero lin2 so the full hot path is exercised (also exercises the
    # bottleneck zero-padding to 128 lanes: bneck = 8 -> 128).
    lin2_nz = 0.05 * jax.random.normal(k_w2, lin2.shape, dtype=jnp.float32)
    out_nz = adapter_relu(x, lin1, lin2_nz)
    jax.block_until_ready(out_nz)
    ref_nz = _reference(x, lin1, lin2_nz)
    assert jnp.allclose(out_nz, ref_nz, atol=1e-4, rtol=1e-4), "mismatch (nonzero lin2)"

    # A ragged, multi-tile shape: exercises the no-pad boundary handling
    # (m = 3*37 = 111 rows does not divide the chosen row tile) and the
    # bneck pad (64 -> 128).
    b2, s2, idim2 = 3, 37, 256
    x_r = jax.random.normal(k_x2, (b2, s2, idim2), dtype=jnp.float32)
    l1_r, _ = init_adapter_params(k_w, idim2)
    l2_r = 0.05 * jax.random.normal(k_w2, (idim2 // 4, idim2), dtype=jnp.float32)
    out_r = adapter_relu(x_r, l1_r, l2_r)
    jax.block_until_ready(out_r)
    ref_r = _reference(x_r, l1_r, l2_r)
    assert jnp.allclose(out_r, ref_r, atol=5e-4, rtol=5e-4), "mismatch (ragged)"

    # bf16 path: weights are cast to bf16 in the wrapper (uniform MXU dtype).
    b3, s3, idim3 = 2, 24, 64
    x_b = jax.random.normal(k_xb, (b3, s3, idim3), dtype=jnp.bfloat16)
    l1_b, _ = init_adapter_params(k_w, idim3)
    l2_b = 0.05 * jax.random.normal(k_w2, (idim3 // 4, idim3), dtype=jnp.float32)
    out_b = adapter_relu(x_b, l1_b, l2_b)
    jax.block_until_ready(out_b)
    ref_b = _reference(x_b.astype(jnp.float32),
                       l1_b.astype(jnp.bfloat16).astype(jnp.float32),
                       l2_b.astype(jnp.bfloat16).astype(jnp.float32))
    assert jnp.allclose(out_b.astype(jnp.float32), ref_b, atol=5e-2, rtol=5e-2), \
        "mismatch (bf16)"

    print("KERNEL_OK")
</pallas_src>

<mosaic_0001>
module attributes {stable_mosaic.version = 11 : i64} {
  func.func @_adapter_kernel(%arg0: i32, %arg1: memref<16x32xf32, #tpu.memory_space<vmem>>, %arg2: memref<32x128xf32, #tpu.memory_space<vmem>>, %arg3: memref<128x32xf32, #tpu.memory_space<vmem>>, %arg4: memref<16x32xf32, #tpu.memory_space<vmem>>) attributes {dimension_semantics = [#tpu.dimension_semantics<parallel>], iteration_bounds = array<i64: 1>, scalar_prefetch = 0 : i64, scratch_operands = 0 : i64, tpu.core_type = #tpu.core_type<tc>, window_params = [{transform_indices = @transform_0, window_bounds = array<i64: 16, 32>}, {pipeline_mode = #tpu.pipeline_mode<synchronous>, transform_indices = @transform_1, window_bounds = array<i64: 32, 128>}, {pipeline_mode = #tpu.pipeline_mode<synchronous>, transform_indices = @transform_2, window_bounds = array<i64: 128, 32>}, {transform_indices = @transform_3, window_bounds = array<i64: 16, 32>}]} {
    %c0 = arith.constant 0 : index
    %c0_0 = arith.constant 0 : index
    %0 = vector.load %arg1[%c0, %c0_0] : memref<16x32xf32, #tpu.memory_space<vmem>>, vector<16x32xf32>
    %c0_1 = arith.constant 0 : index
    %c0_2 = arith.constant 0 : index
    %1 = vector.load %arg2[%c0_1, %c0_2] : memref<32x128xf32, #tpu.memory_space<vmem>>, vector<32x128xf32>
    %cst = arith.constant dense<0.000000e+00> : vector<16x128xf32>
    %2 = tpu.matmul %0, %1, %cst {dimension_numbers = #tpu.dot_dimension_numbers<[1], [0], [0], [1], [0, 0, 1, 1], [], []>} : vector<16x32xf32>, vector<32x128xf32>, vector<16x128xf32> -> vector<16x128xf32>
    %cst_3 = arith.constant 5.000000e-01 : f32
    %3 = vector.broadcast %cst_3 : f32 to vector<16x128xf32>
    %4 = arith.mulf %3, %2 : vector<16x128xf32>
    %cst_4 = arith.constant 0.707106769 : f32
    %5 = vector.broadcast %cst_4 : f32 to vector<16x128xf32>
    %6 = arith.mulf %2, %5 : vector<16x128xf32>
    %7 = math.erf %6 : vector<16x128xf32>
    %cst_5 = arith.constant 1.000000e+00 : f32
    %8 = vector.broadcast %cst_5 : f32 to vector<16x128xf32>
    %9 = arith.addf %8, %7 : vector<16x128xf32>
    %10 = arith.mulf %4, %9 : vector<16x128xf32>
    %c0_6 = arith.constant 0 : index
    %c0_7 = arith.constant 0 : index
    %11 = vector.load %arg3[%c0_6, %c0_7] : memref<128x32xf32, #tpu.memory_space<vmem>>, vector<128x32xf32>
    %cst_8 = arith.constant dense<0.000000e+00> : vector<16x32xf32>
    %12 = tpu.matmul %10, %11, %cst_8 {dimension_numbers = #tpu.dot_dimension_numbers<[1], [0], [0], [1], [0, 0, 1, 1], [], []>} : vector<16x128xf32>, vector<128x32xf32>, vector<16x32xf32> -> vector<16x32xf32>
    %cst_9 = arith.constant 0.000000e+00 : f32
    %13 = vector.broadcast %cst_9 : f32 to vector<16x32xf32>
    %14 = arith.maximumf %12, %13 : vector<16x32xf32>
    %c0_10 = arith.constant 0 : index
    %c0_11 = arith.constant 0 : index
    %15 = vector.load %arg4[%c0_10, %c0_11] : memref<16x32xf32, #tpu.memory_space<vmem>>, vector<16x32xf32>
    tpu.vector_store %arg4[%c0_10, %c0_11], %14 {strides = array<i32>} : memref<16x32xf32, #tpu.memory_space<vmem>>, vector<16x32xf32>,
    return
  }
  func.func @transform_0(%arg0: i32) -> (i32, i32) {
    %c0_i32 = arith.constant 0 : i32
    %c0_i32_0 = arith.constant 0 : i32
    return %arg0, %c0_i32 : i32, i32
  }
  func.func @transform_1(%arg0: i32) -> (i32, i32) {
    %c0_i32 = arith.constant 0 : i32
    %c0_i32_0 = arith.constant 0 : i32
    %c0_i32_1 = arith.constant 0 : i32
    return %c0_i32, %c0_i32_0 : i32, i32
  }
  func.func @transform_2(%arg0: i32) -> (i32, i32) {
    %c0_i32 = arith.constant 0 : i32
    %c0_i32_0 = arith.constant 0 : i32
    %c0_i32_1 = arith.constant 0 : i32
    return %c0_i32, %c0_i32_0 : i32, i32
  }
  func.func @transform_3(%arg0: i32) -> (i32, i32) {
    %c0_i32 = arith.constant 0 : i32
    %c0_i32_0 = arith.constant 0 : i32
    return %arg0, %c0_i32 : i32, i32
  }
}

</mosaic_0001>

<bundles_post_ra>
// kernel: tpu_custom_call.1
= control target key start
LH: loop header
LB: loop body
LE: loop exit
PB: predicated region body
PF: predicated region fallthrough
CT: control target
= control target key end

     0   :  { %vm21_vm0 = vcmask 261120   ;;  %s472_s0 = inlined_call_operand.vmem [shape: f32[16,32], index: 0, kind: input, shape index: {}]   ;;  %s473_s1 = inlined_call_operand.vmem [shape: f32[32,128], index: 1, kind: input, shape index: {}]   ;;  %s474_s2 = inlined_call_operand.vmem [shape: f32[128,32], index: 2, kind: input, shape index: {}]   ;;  %s475_s3 = inlined_call_operand.hbm [shape: f32[16,32], index: 3, kind: output, shape index: {}]  }
   0x1   :  { %v17_v0 = vld [vmem:[%s473_s1] sm:$0xff]  ;;  %v18_v1 = vld [vmem:[%s473_s1 + $0x8] sm:$0xff]  ;;  %v19_v2 = vld [vmem:[%s473_s1 + $0x10] sm:$0xff] }
   0x2   :  { %v296_v3 = vpack.c.bf16 %v18_v1, %v17_v0  ;;  %v20_v4 = vld [vmem:[%s473_s1 + $0x18] sm:$0xff]  ;;  %v15_v5 = vld [vmem:[%s472_s0] sm:$0xff]  ;;  %v114_v8 = vld [vmem:[%s474_s2 + $0x8] sm:$0xff] }
   0x3   :  { %v300_v6 = vpack.c.bf16 %v20_v4, %v19_v2  ;;  %258 = vmatprep.mubr.msk.f32.mxu0 %vm21_vm0, %v15_v5  ;;  %v113_v7 = vld [vmem:[%s474_s2] sm:$0xff]  ;;  %v115_v9 = vld [vmem:[%s474_s2 + $0x10] sm:$0xff]  ;;  %v116_v11 = vld [vmem:[%s474_s2 + $0x18] sm:$0xff] }
   0x4   :  { %297 = vmatprep.subr.bf16.mxu0 %v296_v3  ;;  %v304_v10 = vpack.c.bf16 %v114_v8, %v113_v7  ;;  %v308_v12 = vpack.c.bf16 %v116_v11, %v115_v9  ;;  %v117_v13 = vld [vmem:[%s474_s2 + $0x20] sm:$0xff]  ;;  %v118_v14 = vld [vmem:[%s474_s2 + $0x28] sm:$0xff] }
   0x5   :  { %299 = vmatpush3.bf16.msra.mxu0 %v296_v3 }
   0x6   :  { %8 = vsyncpa [#allocation3], 0  ;;  %301 = vmatprep.subr.bf16.mxu0 %v300_v6  ;;  %305 = vmatprep.subr.bf16.mxu1 %v304_v10  ;;  %v312_v15 = vpack.c.bf16 %v118_v14, %v117_v13  ;;  %v16_v16 = vld [vmem:[%s472_s0 + $0x8] sm:$0xff]  ;;  %v119_v17 = vld [vmem:[%s474_s2 + $0x30] sm:$0xff] }
   0x7   :  { %307 = vmatpush3.bf16.msra.mxu1 %v304_v10  ;;  %v120_v18 = vld [vmem:[%s474_s2 + $0x38] sm:$0xff]  ;;  %v121_v20 = vld [vmem:[%s474_s2 + $0x40] sm:$0xff]  ;;  %v122_v21 = vld [vmem:[%s474_s2 + $0x48] sm:$0xff] }
   0x8   :  { %309 = vmatprep.subr.bf16.mxu1 %v308_v12  ;;  %v316_v19 = vpack.c.bf16 %v120_v18, %v119_v17  ;;  %v320_v22 = vpack.c.bf16 %v122_v21, %v121_v20  ;;  %v123_v23 = vld [vmem:[%s474_s2 + $0x50] sm:$0xff]  ;;  %v124_v24 = vld [vmem:[%s474_s2 + $0x58] sm:$0xff]  ;;  %v125_v26 = vld [vmem:[%s474_s2 + $0x60] sm:$0xff] }
   0x9   :  { %303 = vmatpush3.bf16.msra.mxu0 %v300_v6  ;;  %v324_v25 = vpack.c.bf16 %v124_v24, %v123_v23  ;;  %v126_v27 = vld [vmem:[%s474_s2 + $0x68] sm:$0xff]  ;;  %v127_v29 = vld [vmem:[%s474_s2 + $0x70] sm:$0xff]  ;;  %v128_v30 = vld [vmem:[%s474_s2 + $0x78] sm:$0xff]  ;;  %s367_s2 = smov [#allocation2]  }
   0xa   :  { %v328_v28 = vpack.c.bf16 %v126_v27, %v125_v26  ;;  %v332_v31 = vpack.c.bf16 %v128_v30, %v127_v29  ;;  %s213_s27 = sshll.u32 %s367_s2, 4  ;;  %s214_s27 = int_to_ptr.vmem [resolvable:$true] %s213_s27 }
   0xb   :  { %311 = vmatpush3.bf16.msra.mxu1 %v308_v12  ;;  %s343_s1 = scalar_lea.vmem %s214_s27, 256  ;;  %p348_p1 = scmp.lt.s32.totalorder %s214_s27, %s214_s27 }
   0xc   :  { %259 = vmatmul.mubr.msk.f32.vlgmr.msra.gmra.mrb[0].mxu0 %vm21_vm0, %v16_v16  ;;  %313 = vmatprep.subr.bf16.mxu1 %v312_v15  ;;  %p344_p0 = scmp.ne.s32.totalorder %s214_s27, %s343_s1  ;;  %p349_p2 = scmp.lt.s32.totalorder %s343_s1, %s343_s1 }
   0xe   :  { %p350_p3 = por %p349_p2, %p348_p1 }
   0xf   :  { %315 = vmatpush3.bf16.msra.mxu1 %v312_v15 }
  0x10   :  { %317 = vmatprep.subr.bf16.mxu1 %v316_v19  ;;  %p351_p4 = pnand %p350_p3, %p344_p0 }
  0x13   :  { %319 = vmatpush3.bf16.msra.mxu1 %v316_v19 }
  0x14   :  { %321 = vmatprep.subr.bf16.mxu1 %v320_v22 }
  0x17   :  { %323 = vmatpush3.bf16.msra.mxu1 %v320_v22 }
  0x18   :  { %325 = vmatprep.subr.bf16.mxu1 %v324_v25 }
  0x1b   :  { %327 = vmatpush3.bf16.msra.mxu1 %v324_v25 }
  0x1c   :  { %329 = vmatprep.subr.bf16.mxu1 %v328_v28 }
  0x1f   :  { %331 = vmatpush3.bf16.msra.mxu1 %v328_v28 }
  0x20   :  { %333 = vmatprep.subr.bf16.mxu1 %v332_v31 }
  0x23   :  { %335 = vmatpush3.bf16.msra.mxu1 %v332_v31 }
  0xdf   :  { %v260_v32 = vpop.f32.mrb[0].mxu0 }
  0xe0   :  { %v106_v33 = vmul.f32 0.70710677, %v260_v32  ;;  %v94_v34 = vpop.f32.mrb[1].mxu0  ;;  %v104_v41 = vmul.f32 0.5, %v260_v32 }
  0xe1   :  { %v105_v35 = vmul.f32 0.70710677, %v94_v34  ;;  %v103_v39 = vmul.f32 0.5, %v94_v34 }
  0xe2   :  { %339 = verf.f32 %v106_v33 }
  0xe3   :  { %341 = verf.f32 %v105_v35 }
  0xec   :  { %v340_v36 = vpop.eup %339 }
  0xed   :  { %v342_v37 = vpop.eup %341  ;;  %v110_v38 = vadd.f32 1.0, %v340_v36 }
  0xee   :  { %v109_v40 = vadd.f32 1.0, %v342_v37 }
  0xef   :  { %v112_v43 = vmul.f32 %v110_v38, %v104_v41 }
  0xf0   :  { %v111_v42 = vmul.f32 %v109_v40, %v103_v39 }
  0xf2   :  { %293 = vmatprep.mubr.f32.mxu1 %v111_v42 }
  0xf3   :  { %294 = vmatmul.mubr.f32.vlgmr.msra.gmra.mrb[0].mxu1 %v112_v43 }
 0x1c6   :  { %v295_v44 = vpop.f32.mrb[0].mxu1 }
 0x1c7   :  { %v205_v45 = vmax.f32 %v295_v44, 0.0  ;;  %v195_v46 = vpop.f32.mrb[1].mxu1 }
 0x1c8   :  { %v204_v47 = vmax.f32 %v195_v46, 0.0 }
 0x1c9   :  { %207 = vst.msk [vmem:[#allocation2 + $0x8] sm:$0xff] %vm21_vm0, %v205_v45 }
 0x1ca   :  { %206 = vst.msk [vmem:[#allocation2] sm:$0xff] %vm21_vm0, %v204_v47 }
 0x1cb   :  { %354 = shalt.err (!%p351_p4)
}
 0x1cc   :  { %s355_s30 = scalar_lea.hbm %s475_s3, 256 }
 0x1cd   :  { %p356_p5 = scmp.ne.s32.totalorder %s475_s3, %s355_s30  ;;  %p359_p6 = scmp.lt.u32.totalorder %s355_s30, %s475_s3 }
 0x1cf   :  { %p361_p7 = pnand %p359_p6, %p356_p5 }
 0x1d1   :  { %364 = shalt.err (!%p361_p7)
}
 0x1d2   :  { %s368_s8 = smov 128   ;;  %s369_s9 = smov 8  }
 0x1d3   :  { %219 = dma.vmem_to_hbm [thread:$0]  %s214_s27, 256, %s475_s3, [#allocation3], %s368_s8, %s368_s8, %s369_s9  }
 0x1d4   :  { %365 = dma.done.wait [#allocation3], 256  }
 0x1d5   :  { %366 = vsyncadd [#allocation3], 4294967040 }
 0x1d6   :  { %223 = vsyncpa [#allocation3], 1 }

</bundles_post_ra>
